<compile_context>
chip_gen: v7x
topology: tpu7x:2x2x1
jax: 0.10.0
libtpu: 0.0.40
codegen_flags: <defaults>
</compile_context>

<pallas_src>
import functools

import jax
import jax.numpy as jnp
from jax import lax
from jax.experimental import pallas as pl
from jax.experimental.pallas import tpu as pltpu


_LANES = 128
_OUT_ROWS = 8                     # output rows: 0:A log-probs, A value, rest 0
_HID = 64                         # hidden width of every Linear layer

# Row layout of the packed bf16 parameter array [_PACK_ROWS, 128]:
_COL_R0, _COL_R1 = 0, 128         # "column block": W1^T columns + all biases
_W2_R0, _W2_R1 = 128, 256         # W2^T                [out, in]
_WH1_R0, _WH1_R1 = 256, 384       # [Wa1^T ; Wc1^T]     (fused head layer 1)
_WH2_R0, _WH2_R1 = 384, 400       # [Wa2^T ; wc2^T]     (fused head layer 2)
_PACK_ROWS = _WH2_R1              # 400: multiple of 16 (bf16 sublane packing)

# Lane assignment inside the column block (features live in sublanes):
_L_W1 = 0                         # lanes 0..2: columns of W1^T (= rows of W1)
_L_B1 = 3
_L_B2 = 4
_L_BH1 = 5                        # fused [ba1 ; bc1]
_L_BH2 = 6                        # fused [ba2 ; bc2]   (rows 0:A, row A)


def _ac_kernel(obs_ref, p_ref, out_ref, *, num_actions):
    """One batch tile, feature-major: obs [3, Bt] -> out [8, Bt] (f32)."""
    A = num_actions
    bt = out_ref.shape[1]

    x = obs_ref[...].astype(jnp.float32)                       # [3, Bt]
    cols = p_ref[_COL_R0:_COL_R1, :].astype(jnp.float32)       # [128, 128]

    # ---- common layer 1: Linear(3,64)+ReLU on the VPU (K=3 is MXU-hostile) --
    h = cols[:, _L_B1:_L_B1 + 1]                               # b1  [128, 1]
    h = h + cols[:, _L_W1 + 0:_L_W1 + 1] * x[0:1, :]
    h = h + cols[:, _L_W1 + 1:_L_W1 + 2] * x[1:2, :]
    h = h + cols[:, _L_W1 + 2:_L_W1 + 3] * x[2:3, :]
    h = jnp.maximum(h, 0.0)                                    # [128, Bt]

    # ---- common layer 2: Linear(64,64)+ReLU (bf16 MXU, f32 accumulation) ----
    h = jnp.dot(p_ref[_W2_R0:_W2_R1, :], h.astype(jnp.bfloat16),
                preferred_element_type=jnp.float32)
    h = jnp.maximum(h + cols[:, _L_B2:_L_B2 + 1], 0.0)

    # ---- fused actor/critic hidden layer (rows 0:64 actor, 64:128 critic) ---
    y = jnp.dot(p_ref[_WH1_R0:_WH1_R1, :], h.astype(jnp.bfloat16),
                preferred_element_type=jnp.float32)
    y = jnp.maximum(y + cols[:, _L_BH1:_L_BH1 + 1], 0.0)

    # ---- fused output layer -> [16, Bt]: rows 0:A logits, row A value -------
    fused = jnp.dot(p_ref[_WH2_R0:_WH2_R1, :], y.astype(jnp.bfloat16),
                    preferred_element_type=jnp.float32)
    fused = fused + cols[0:_WH2_R1 - _WH2_R0, _L_BH2:_L_BH2 + 1]

    # ---- log-softmax over only the A valid logit rows (A static & tiny) -----
    logit_rows = [fused[a:a + 1, :] for a in range(A)]          # A x [1, Bt]
    m = logit_rows[0]
    for r in logit_rows[1:]:
        m = jnp.maximum(m, r)
    s = jnp.exp(logit_rows[0] - m)
    for r in logit_rows[1:]:
        s = s + jnp.exp(r - m)
    lse = m + jnp.log(s)                                        # [1, Bt]

    # Rows 0:A get the log-softmax correction; row A (value) / padding do not.
    row_id = lax.broadcasted_iota(jnp.int32, (_OUT_ROWS, bt), 0)
    out_ref[...] = fused[0:_OUT_ROWS, :] - jnp.where(row_id < A, lse, 0.0)


def pack_params(params, num_actions, use_critic=True):
    """Pack all weights/biases into one lane-dense bf16 [400, 128] array.

    Call ONCE per parameter update and reuse the result for every forward call
    (packing compiles to a pile of scatter/concat ops you don't want per step).
    """
    A = num_actions
    assert A + 1 <= _OUT_ROWS, "num_actions + 1 must fit in 8 output rows"
    f32 = jnp.float32
    a32 = lambda v: jnp.asarray(v, f32)

    cols = jnp.zeros((_LANES, _LANES), f32)
    cols = cols.at[:_HID, _L_W1:_L_W1 + 3].set(a32(params["w1"]).T)   # [64, 3]
    cols = cols.at[:_HID, _L_B1].set(a32(params["b1"]).reshape(-1))
    cols = cols.at[:_HID, _L_B2].set(a32(params["b2"]).reshape(-1))
    cols = cols.at[:_HID, _L_BH1].set(a32(params["ba1"]).reshape(-1))
    cols = cols.at[:A, _L_BH2].set(a32(params["ba2"]).reshape(-1))

    w2t = jnp.zeros((_LANES, _LANES), f32)
    w2t = w2t.at[:_HID, :_HID].set(a32(params["w2"]).T)

    wh1t = jnp.zeros((_LANES, _LANES), f32)
    wh1t = wh1t.at[:_HID, :_HID].set(a32(params["wa1"]).T)

    wh2t = jnp.zeros((_WH2_R1 - _WH2_R0, _LANES), f32)
    wh2t = wh2t.at[:A, :_HID].set(a32(params["wa2"]).T)

    if use_critic:
        cols = cols.at[_HID:2 * _HID, _L_BH1].set(a32(params["bc1"]).reshape(-1))
        cols = cols.at[A, _L_BH2].set(a32(params["bc2"]).reshape(()))
        wh1t = wh1t.at[_HID:2 * _HID, :_HID].set(a32(params["wc1"]).T)
        wh2t = wh2t.at[A, _HID:2 * _HID].set(a32(params["wc2"]).reshape(-1))

    packed = jnp.concatenate([cols, w2t, wh1t, wh2t], axis=0)
    assert packed.shape == (_PACK_ROWS, _LANES)
    return packed.astype(jnp.bfloat16)


def _round_up(x, m):
    return ((x + m - 1) // m) * m


def blackjack_ac_forward(obs, packed_params, num_actions, use_critic=True,
                         batch_tile=1024):
    """Fused actor-critic forward.

    obs:            [B, 3] float32 observations.
    packed_params:  result of pack_params() (pack once, reuse every call).
    Returns (log_probs [B, num_actions] f32, value [B, 1] f32).  When
    use_critic=False, value is zeros, matching the PyTorch module.
    """
    B = obs.shape[0]
    A = num_actions
    assert A + 1 <= _OUT_ROWS

    # Lane-aligned batch tile; pad B so the grid always covers it exactly.
    batch_tile = max(_LANES, _round_up(batch_tile, _LANES))
    tile = min(batch_tile, _round_up(max(B, 1), _LANES))
    b_pad = _round_up(B, tile)
    num_tiles = b_pad // tile

    # Feature-major, lane-dense obs: [3, b_pad] (batch in the lane dim).
    obs_t = jnp.zeros((3, b_pad), jnp.float32)
    obs_t = obs_t.at[:, :B].set(obs.astype(jnp.float32).T)

    out = pl.pallas_call(
        functools.partial(_ac_kernel, num_actions=A),
        out_shape=jax.ShapeDtypeStruct((_OUT_ROWS, b_pad), jnp.float32),
        grid=(num_tiles,),
        in_specs=[
            pl.BlockSpec((3, tile), lambda i: (0, i)),
            # Constant block index: params stay resident in VMEM across steps.
            pl.BlockSpec((_PACK_ROWS, _LANES), lambda i: (0, 0)),
        ],
        out_specs=pl.BlockSpec((_OUT_ROWS, tile), lambda i: (0, i)),
        compiler_params=pltpu.CompilerParams(
            # Batch tiles are independent -> shard across TensorCores (v7x).
            dimension_semantics=("parallel",)),
    )(obs_t, packed_params)

    logp = out[:A, :B].T                                        # [B, A]
    if use_critic:
        value = out[A:A + 1, :B].T                              # [B, 1]
    else:
        value = jnp.zeros((B, 1), jnp.float32)
    return logp, value


def init_params(key, num_actions):
    """Deterministic PyTorch-style (uniform +/- 1/sqrt(fan_in)) init."""
    def linear(key, fan_in, fan_out):
        kw, kb = jax.random.split(key)
        bound = 1.0 / jnp.sqrt(float(fan_in))
        w = jax.random.uniform(kw, (fan_in, fan_out), jnp.float32, -bound, bound)
        b = jax.random.uniform(kb, (1, fan_out), jnp.float32, -bound, bound)
        return w, b

    keys = jax.random.split(key, 6)
    w1, b1 = linear(keys[0], 3, 64)
    w2, b2 = linear(keys[1], 64, 64)
    wa1, ba1 = linear(keys[2], 64, 64)
    wa2, ba2 = linear(keys[3], 64, num_actions)
    wc1, bc1 = linear(keys[4], 64, 64)
    wc2, bc2 = linear(keys[5], 64, 1)
    return dict(w1=w1, b1=b1, w2=w2, b2=b2,
                wa1=wa1, ba1=ba1, wa2=wa2, ba2=ba2,
                wc1=wc1, bc1=bc1, wc2=wc2, bc2=bc2)


def _reference_forward(obs, p, use_critic=True):
    """Pure-JAX unfused reference mirroring the kernel's numerics
    (bf16 weights / bf16 activations into the MXU, f32 accumulation)."""
    f32, bf16 = jnp.float32, jnp.bfloat16
    q = lambda w: jnp.asarray(w, f32).astype(bf16)              # weight quant
    mm = lambda x, w: jnp.dot(x.astype(bf16), q(w), preferred_element_type=f32)

    obs = jnp.asarray(obs, f32)
    # Layer 1 is evaluated in f32 on the VPU inside the kernel.
    h = jnp.maximum(
        jnp.dot(obs, q(p["w1"]).astype(f32), precision=lax.Precision.HIGHEST)
        + q(p["b1"]).astype(f32), 0.0)
    h = jnp.maximum(mm(h, p["w2"]) + q(p["b2"]).astype(f32), 0.0)
    a = jnp.maximum(mm(h, p["wa1"]) + q(p["ba1"]).astype(f32), 0.0)
    logits = mm(a, p["wa2"]) + q(p["ba2"]).astype(f32)
    logp = jax.nn.log_softmax(logits, axis=-1)
    if use_critic:
        c = jnp.maximum(mm(h, p["wc1"]) + q(p["bc1"]).astype(f32), 0.0)
        value = mm(c, p["wc2"]) + q(p["bc2"]).astype(f32)
    else:
        value = jnp.zeros((obs.shape[0], 1), f32)
    return logp, value


if __name__ == "__main__":
    num_actions = 2          # blackjack: hit / stand
    batch = 8

    key = jax.random.PRNGKey(0)
    k_params, k_obs = jax.random.split(key)
    params = init_params(k_params, num_actions)

    # Blackjack observation: (player_sum, dealer_card, usable_ace) as floats.
    obs = jnp.stack([
        jax.random.uniform(k_obs, (batch,), jnp.float32, 4.0, 21.0),
        jax.random.uniform(jax.random.fold_in(k_obs, 1), (batch,),
                           jnp.float32, 1.0, 10.0),
        (jax.random.uniform(jax.random.fold_in(k_obs, 2), (batch,)) > 0.5
         ).astype(jnp.float32),
    ], axis=-1)

    # Pack parameters ONCE (per parameter update) and reuse every forward call.
    packed = jax.block_until_ready(pack_params(params, num_actions, True))
    fwd = jax.jit(functools.partial(blackjack_ac_forward,
                                    num_actions=num_actions, use_critic=True))

    ref_logp, ref_value = _reference_forward(obs, params, use_critic=True)

    # --- small batch (single 128-wide tile), critic on ---
    logp, value = jax.block_until_ready(fwd(obs, packed))
    assert logp.shape == (batch, num_actions)
    assert value.shape == (batch, 1)
    assert jnp.allclose(logp, ref_logp, atol=1e-2, rtol=1e-3), (
        float(jnp.max(jnp.abs(logp - ref_logp))))
    assert jnp.allclose(value, ref_value, atol=1e-2, rtol=1e-3), (
        float(jnp.max(jnp.abs(value - ref_value))))

    # --- actor-only configuration (no critic params at all) ---
    params_na = {k: v for k, v in params.items()
                 if not k.startswith(("wc", "bc"))}
    packed_na = pack_params(params_na, num_actions, use_critic=False)
    fwd_na = jax.jit(functools.partial(blackjack_ac_forward,
                                       num_actions=num_actions,
                                       use_critic=False))
    logp_na, value_na = jax.block_until_ready(fwd_na(obs, packed_na))
    assert jnp.allclose(logp_na, ref_logp, atol=1e-2, rtol=1e-3)
    assert jnp.all(value_na == 0.0)

    # --- batch that is NOT a tile multiple: exercises wrapper padding and a
    #     multi-step "parallel" grid (4 tiles of 256) ---
    big = 1000
    obs_big = jnp.tile(obs, (big // batch, 1))
    fwd_big = jax.jit(functools.partial(blackjack_ac_forward,
                                        num_actions=num_actions,
                                        use_critic=True, batch_tile=256))
    logp_b, value_b = jax.block_until_ready(fwd_big(obs_big, packed))
    ref_lb, ref_vb = _reference_forward(obs_big, params, use_critic=True)
    assert logp_b.shape == (big, num_actions) and value_b.shape == (big, 1)
    assert jnp.allclose(logp_b, ref_lb, atol=1e-2, rtol=1e-3)
    assert jnp.allclose(value_b, ref_vb, atol=1e-2, rtol=1e-3)

    # Categorical(logits=log_probs) is fully determined by the returned
    # log-probs; the distribution object itself has no array equivalent.
    print("KERNEL_OK")
</pallas_src>

<mosaic_0001>
module attributes {stable_mosaic.version = 11 : i64} {
  func.func @_ac_kernel(%arg0: i32, %arg1: memref<3x128xf32, #tpu.memory_space<vmem>>, %arg2: memref<400x128xbf16, #tpu.memory_space<vmem>>, %arg3: memref<8x128xf32, #tpu.memory_space<vmem>>) attributes {dimension_semantics = [#tpu.dimension_semantics<parallel>], iteration_bounds = array<i64: 1>, scalar_prefetch = 0 : i64, scratch_operands = 0 : i64, tpu.core_type = #tpu.core_type<tc>, window_params = [{transform_indices = @transform_0, window_bounds = array<i64: 3, 128>}, {pipeline_mode = #tpu.pipeline_mode<synchronous>, transform_indices = @transform_1, window_bounds = array<i64: 400, 128>}, {transform_indices = @transform_2, window_bounds = array<i64: 8, 128>}]} {
    %c0 = arith.constant 0 : index
    %c0_0 = arith.constant 0 : index
    %0 = vector.load %arg1[%c0, %c0_0] : memref<3x128xf32, #tpu.memory_space<vmem>>, vector<3x128xf32>
    %c0_1 = arith.constant 0 : index
    %c0_2 = arith.constant 0 : index
    %1 = vector.load %arg2[%c0_1, %c0_2] : memref<400x128xbf16, #tpu.memory_space<vmem>>, vector<128x128xbf16>
    %2 = arith.extf %1 : vector<128x128xbf16> to vector<128x128xf32>
    %3 = vector.extract_strided_slice %2 {offsets = [0, 3], sizes = [128, 1], strides = [1, 1]} : vector<128x128xf32> to vector<128x1xf32>
    %4 = vector.extract_strided_slice %2 {offsets = [0, 0], sizes = [128, 1], strides = [1, 1]} : vector<128x128xf32> to vector<128x1xf32>
    %5 = vector.extract_strided_slice %0 {offsets = [0, 0], sizes = [1, 128], strides = [1, 1]} : vector<3x128xf32> to vector<1x128xf32>
    %6 = vector.broadcast %4 : vector<128x1xf32> to vector<128x128xf32>
    %7 = vector.broadcast %5 : vector<1x128xf32> to vector<128x128xf32>
    %8 = arith.mulf %6, %7 : vector<128x128xf32>
    %9 = vector.broadcast %3 : vector<128x1xf32> to vector<128x128xf32>
    %10 = arith.addf %9, %8 : vector<128x128xf32>
    %11 = vector.extract_strided_slice %2 {offsets = [0, 1], sizes = [128, 1], strides = [1, 1]} : vector<128x128xf32> to vector<128x1xf32>
    %12 = vector.extract_strided_slice %0 {offsets = [1, 0], sizes = [1, 128], strides = [1, 1]} : vector<3x128xf32> to vector<1x128xf32>
    %13 = vector.broadcast %11 : vector<128x1xf32> to vector<128x128xf32>
    %14 = vector.broadcast %12 : vector<1x128xf32> to vector<128x128xf32>
    %15 = arith.mulf %13, %14 : vector<128x128xf32>
    %16 = arith.addf %10, %15 : vector<128x128xf32>
    %17 = vector.extract_strided_slice %2 {offsets = [0, 2], sizes = [128, 1], strides = [1, 1]} : vector<128x128xf32> to vector<128x1xf32>
    %18 = vector.extract_strided_slice %0 {offsets = [2, 0], sizes = [1, 128], strides = [1, 1]} : vector<3x128xf32> to vector<1x128xf32>
    %19 = vector.broadcast %17 : vector<128x1xf32> to vector<128x128xf32>
    %20 = vector.broadcast %18 : vector<1x128xf32> to vector<128x128xf32>
    %21 = arith.mulf %19, %20 : vector<128x128xf32>
    %22 = arith.addf %16, %21 : vector<128x128xf32>
    %cst = arith.constant 0.000000e+00 : f32
    %23 = vector.broadcast %cst : f32 to vector<128x128xf32>
    %24 = arith.maximumf %22, %23 : vector<128x128xf32>
    %c128 = arith.constant 128 : index
    %c0_3 = arith.constant 0 : index
    %25 = vector.load %arg2[%c128, %c0_3] : memref<400x128xbf16, #tpu.memory_space<vmem>>, vector<128x128xbf16>
    %26 = arith.truncf %24 : vector<128x128xf32> to vector<128x128xbf16>
    %cst_4 = arith.constant dense<0.000000e+00> : vector<128x128xf32>
    %27 = tpu.matmul %25, %26, %cst_4 {dimension_numbers = #tpu.dot_dimension_numbers<[1], [0], [0], [1], [0, 0, 1, 1], [], []>} : vector<128x128xbf16>, vector<128x128xbf16>, vector<128x128xf32> -> vector<128x128xf32>
    %28 = vector.extract_strided_slice %2 {offsets = [0, 4], sizes = [128, 1], strides = [1, 1]} : vector<128x128xf32> to vector<128x1xf32>
    %29 = vector.broadcast %28 : vector<128x1xf32> to vector<128x128xf32>
    %30 = arith.addf %27, %29 : vector<128x128xf32>
    %cst_5 = arith.constant 0.000000e+00 : f32
    %31 = vector.broadcast %cst_5 : f32 to vector<128x128xf32>
    %32 = arith.maximumf %30, %31 : vector<128x128xf32>
    %c256 = arith.constant 256 : index
    %c0_6 = arith.constant 0 : index
    %33 = vector.load %arg2[%c256, %c0_6] : memref<400x128xbf16, #tpu.memory_space<vmem>>, vector<128x128xbf16>
    %34 = arith.truncf %32 : vector<128x128xf32> to vector<128x128xbf16>
    %cst_7 = arith.constant dense<0.000000e+00> : vector<128x128xf32>
    %35 = tpu.matmul %33, %34, %cst_7 {dimension_numbers = #tpu.dot_dimension_numbers<[1], [0], [0], [1], [0, 0, 1, 1], [], []>} : vector<128x128xbf16>, vector<128x128xbf16>, vector<128x128xf32> -> vector<128x128xf32>
    %36 = vector.extract_strided_slice %2 {offsets = [0, 5], sizes = [128, 1], strides = [1, 1]} : vector<128x128xf32> to vector<128x1xf32>
    %37 = vector.broadcast %36 : vector<128x1xf32> to vector<128x128xf32>
    %38 = arith.addf %35, %37 : vector<128x128xf32>
    %cst_8 = arith.constant 0.000000e+00 : f32
    %39 = vector.broadcast %cst_8 : f32 to vector<128x128xf32>
    %40 = arith.maximumf %38, %39 : vector<128x128xf32>
    %c384 = arith.constant 384 : index
    %c0_9 = arith.constant 0 : index
    %41 = vector.load %arg2[%c384, %c0_9] : memref<400x128xbf16, #tpu.memory_space<vmem>>, vector<16x128xbf16>
    %42 = arith.truncf %40 : vector<128x128xf32> to vector<128x128xbf16>
    %cst_10 = arith.constant dense<0.000000e+00> : vector<16x128xf32>
    %43 = tpu.matmul %41, %42, %cst_10 {dimension_numbers = #tpu.dot_dimension_numbers<[1], [0], [0], [1], [0, 0, 1, 1], [], []>} : vector<16x128xbf16>, vector<128x128xbf16>, vector<16x128xf32> -> vector<16x128xf32>
    %44 = vector.extract_strided_slice %2 {offsets = [0, 6], sizes = [16, 1], strides = [1, 1]} : vector<128x128xf32> to vector<16x1xf32>
    %45 = vector.broadcast %44 : vector<16x1xf32> to vector<16x128xf32>
    %46 = arith.addf %43, %45 : vector<16x128xf32>
    %47 = vector.extract_strided_slice %46 {offsets = [0, 0], sizes = [1, 128], strides = [1, 1]} : vector<16x128xf32> to vector<1x128xf32>
    %48 = vector.extract_strided_slice %46 {offsets = [1, 0], sizes = [1, 128], strides = [1, 1]} : vector<16x128xf32> to vector<1x128xf32>
    %49 = arith.maximumf %47, %48 : vector<1x128xf32>
    %50 = arith.subf %47, %49 : vector<1x128xf32>
    %51 = math.exp %50 : vector<1x128xf32>
    %52 = arith.subf %48, %49 : vector<1x128xf32>
    %53 = math.exp %52 : vector<1x128xf32>
    %54 = arith.addf %51, %53 : vector<1x128xf32>
    %55 = math.log %54 : vector<1x128xf32>
    %56 = arith.addf %49, %55 : vector<1x128xf32>
    %57 = tpu.iota {dimensions = array<i32: 0>} : vector<8x128xi32>
    %58 = vector.extract_strided_slice %46 {offsets = [0, 0], sizes = [8, 128], strides = [1, 1]} : vector<16x128xf32> to vector<8x128xf32>
    %c2_i32 = arith.constant 2 : i32
    %59 = vector.broadcast %c2_i32 : i32 to vector<8x128xi32>
    %60 = arith.cmpi slt, %57, %59 : vector<8x128xi32>
    %cst_11 = arith.constant 0.000000e+00 : f32
    %61 = vector.shape_cast %56 : vector<1x128xf32> to vector<1x128xf32>
    %62 = vector.broadcast %61 : vector<1x128xf32> to vector<8x128xf32>
    %63 = vector.broadcast %cst_11 : f32 to vector<8x128xf32>
    %64 = arith.select %60, %62, %63 : vector<8x128xi1>, vector<8x128xf32>
    %65 = arith.subf %58, %64 : vector<8x128xf32>
    %c0_12 = arith.constant 0 : index
    %c0_13 = arith.constant 0 : index
    %66 = vector.load %arg3[%c0_12, %c0_13] : memref<8x128xf32, #tpu.memory_space<vmem>>, vector<8x128xf32>
    tpu.vector_store %arg3[%c0_12, %c0_13], %65 {strides = array<i32>} : memref<8x128xf32, #tpu.memory_space<vmem>>, vector<8x128xf32>,
    return
  }
  func.func @transform_0(%arg0: i32) -> (i32, i32) {
    %c0_i32 = arith.constant 0 : i32
    %c0_i32_0 = arith.constant 0 : i32
    return %c0_i32, %arg0 : i32, i32
  }
  func.func @transform_1(%arg0: i32) -> (i32, i32) {
    %c0_i32 = arith.constant 0 : i32
    %c0_i32_0 = arith.constant 0 : i32
    %c0_i32_1 = arith.constant 0 : i32
    return %c0_i32, %c0_i32_0 : i32, i32
  }
  func.func @transform_2(%arg0: i32) -> (i32, i32) {
    %c0_i32 = arith.constant 0 : i32
    %c0_i32_0 = arith.constant 0 : i32
    return %c0_i32, %arg0 : i32, i32
  }
}

</mosaic_0001>

<bundles_post_ra>
// kernel: blackjack_ac_forward.1
= control target key start
LH: loop header
LB: loop body
LE: loop exit
PB: predicated region body
PF: predicated region fallthrough
CT: control target
= control target key end

     0   :  { %7 = vsyncpa [#allocation3], 0  ;;  %s1611_s9 = smov [#allocation2]   ;;  %s1836_s0 = inlined_call_operand.vmem [shape: f32[3,128], index: 0, kind: input, shape index: {}]   ;;  %s1837_s1 = inlined_call_operand.hbm [shape: bf16[400,128], index: 1, kind: input, shape index: {}]   ;;  %s1838_s2 = inlined_call_operand.vmem [shape: f32[8,128], index: 2, kind: output, shape index: {}]  }
   0x1   :  { %s15_s10 = sshll.u32 %s1611_s9, 4  ;;  %s1587_s13 = scalar_lea.hbm %s1837_s1, 3200  ;;  %s16_s10 = int_to_ptr.vmem [resolvable:$true] %s15_s10 }
   0x2   :  { %p1588_p0 = scmp.ne.s32.totalorder %s1837_s1, %s1587_s13  ;;  %p1591_p1 = scmp.lt.u32.totalorder %s1587_s13, %s1837_s1 }
   0x4   :  { %p1593_p2 = pnand %p1591_p1, %p1588_p0 }
   0x6   :  { %1596 = shalt.err (!%p1593_p2)
}
   0x7   :  { %s1597_s18 = scalar_lea.vmem %s16_s10, 3200  ;;  %p1602_p4 = scmp.lt.s32.totalorder %s16_s10, %s16_s10 }
   0x8   :  { %p1598_p3 = scmp.ne.s32.totalorder %s16_s10, %s1597_s18  ;;  %p1603_p5 = scmp.lt.s32.totalorder %s1597_s18, %s1597_s18 }
   0xa   :  { %p1604_p6 = por %p1603_p5, %p1602_p4 }
   0xc   :  { %p1605_p7 = pnand %p1604_p6, %p1598_p3 }
   0xe   :  { %1608 = shalt.err (!%p1605_p7)
}
   0xf   :  { %s1612_s19 = smov 64   ;;  %s1613_s20 = smov 4  }
  0x10   :  { %21 = dma.hbm_to_vmem [thread:$0]  %s1837_s1, 3200, %s16_s10, [#allocation3], %s1612_s19, %s1612_s19, %s1613_s20  }
  0x11   :  { %1609 = dma.done.wait [#allocation3], 3200  }
  0x12   :  { %1610 = vsyncadd [#allocation3], 4294964096  ;;  %v1614_v0 = vmov 1   ;;  %v1615_v1 = vmov 3   ;;  %v1652_v2 = vld [vmem:[#allocation2] sm:$0xff]   ;;  %v1100_v3 = vld [vmem:[#allocation2 + $0x8] sm:$0xff]   ;;  %v139_v39 = vlaneseq }
  0x13   :  { %1250 = vset.pattern.permute.xlu1 %v1614_v0  ;;  %1244 = vset.pattern.permute.xlu0 %v1615_v1  ;;  %v1070_v4 = vunpack.c.l.bf16 %v1652_v2  ;;  %v1071_v5 = vunpack.c.h.bf16 %v1652_v2  ;;  %v1074_v6 = vunpack.c.l.bf16 %v1100_v3  ;;  %v1075_v7 = vunpack.c.h.bf16 %v1100_v3  ;;  %v1102_v8 = vld [vmem:[#allocation2 + $0x18] sm:$0xff]   ;;  %v1101_v16 = vld [vmem:[#allocation2 + $0x10] sm:$0xff]   ;;  %v1104_v19 = vld [vmem:[#allocation2 + $0x28] sm:$0xff]  }
  0x14   :  { %v1082_v11 = vunpack.c.l.bf16 %v1102_v8  ;;  %v1083_v12 = vunpack.c.h.bf16 %v1102_v8  ;;  %v1616_v13 = vmov 0   ;;  %v1617_v15 = vmov 2   ;;  %v1105_v24 = vld [vmem:[#allocation2 + $0x30] sm:$0xff]   ;;  %v1103_v25 = vld [vmem:[#allocation2 + $0x20] sm:$0xff]   ;;  %v1106_v31 = vld [vmem:[#allocation2 + $0x38] sm:$0xff]  }
  0x15   :  { %v1658_v9 = vpack.i.bf16 %v1071_v5, %v1070_v4  ;;  %v1662_v10 = vpack.i.bf16 %v1075_v7, %v1074_v6  ;;  %v1078_v17 = vunpack.c.l.bf16 %v1101_v16  ;;  %v1079_v18 = vunpack.c.h.bf16 %v1101_v16  ;;  %v1516_v36 = vld [vmem:[#allocation2 + $0x40] sm:$0xff]  }
  0x16   :  { %v1666_v14 = vpack.i.bf16 %v1083_v12, %v1082_v11  ;;  %v1090_v21 = vunpack.c.l.bf16 %v1104_v19  ;;  %v1091_v22 = vunpack.c.h.bf16 %v1104_v19  ;;  %v1094_v26 = vunpack.c.l.bf16 %v1105_v24  ;;  %1164 = vmatprep.mubr.bf16.mxu0 %v1516_v36  ;;  %v26_v47 = vld [vmem:[%s1836_s0] sm:$0x7] }
  0x17   :  { %1252 = vperm.xlu1 %1250, %v1658_v9   ;;  %1246 = vperm.xlu0 %1244, %v1658_v9   ;;  %v1676_v20 = vpack.i.bf16 %v1079_v18, %v1078_v17  ;;  %v1095_v27 = vunpack.c.h.bf16 %v1105_v24  ;;  %v1086_v29 = vunpack.c.l.bf16 %v1103_v25  ;;  %v1087_v30 = vunpack.c.h.bf16 %v1103_v25 }
  0x18   :  { %v1680_v23 = vpack.i.bf16 %v1091_v22, %v1090_v21  ;;  %v1098_v33 = vunpack.c.l.bf16 %v1106_v31  ;;  %v1099_v34 = vunpack.c.h.bf16 %v1106_v31  ;;  %v1725_v41 = vshrl.u32 %v139_v39, 7 }
  0x19   :  { %v1691_v28 = vpack.i.bf16 %v1095_v27, %v1094_v26  ;;  %v1697_v32 = vpack.i.bf16 %v1087_v30, %v1086_v29  ;;  %v1618_v45 = vmov 4   ;;  %vm1621_vm0 = vmmov 0  }
  0x1a   :  { %v1702_v35 = vpack.i.bf16 %v1099_v34, %v1098_v33  ;;  %v141_v43 = vsub.s32 0, %v1725_v41  ;;  %v305_v46 = vsub.s32 1, %v1725_v41  ;;  %v405_v52 = vsub.s32 2, %v1725_v41 }
  0x1b   :  { %1256 = vset.pattern.permute.xlu1 %v1616_v13  ;;  %1269 = vperm.xlu0 %1244, %v1662_v10   ;;  %vm1038_vm1 = vcmp.lt.s32.totalorder %v1725_v41, 2 }
  0x1c   :  { %1258 = vperm.xlu1 %1256, %v1662_v10   ;;  %v1737_v50 = vrot.slane %v26_v47, %v141_v43  ;;  %v1743_v54 = vrot.slane %v26_v47, %v305_v46  ;;  %v1749_v62 = vrot.slane %v26_v47, %v405_v52 }
  0x1f   :  { %1304 = vperm.xlu0 %1244, %v1666_v14  }
  0x20   :  { %1262 = vset.pattern.permute.xlu1 %v1617_v15 }
  0x21   :  { %1264 = vperm.xlu1 %1262, %v1658_v9  }
  0x23   :  { %1320 = vset.pattern.permute.xlu0 %v1617_v15 }
  0x24   :  { %1322 = vperm.xlu0 %1320, %v1666_v14  }
  0x25   :  { %1273 = vset.pattern.permute.xlu1 %v1614_v0 }
  0x26   :  { %1275 = vperm.xlu1 %1273, %v1662_v10  }
  0x28   :  { %1326 = vset.pattern.permute.xlu0 %v1616_v13 }
  0x29   :  { %1328 = vperm.xlu0 %1326, %v1658_v9  }
  0x2a   :  { %1279 = vset.pattern.permute.xlu1 %v1617_v15 }
  0x2b   :  { %1281 = vperm.xlu1 %1279, %v1662_v10  }
  0x2d   :  { %1333 = vperm.xlu0 %1326, %v1676_v20  }
  0x2f   :  { %1285 = vset.pattern.permute.xlu1 %v1615_v1 }
  0x30   :  { %1287 = vperm.xlu1 %1285, %v1676_v20  }
  0x31   :  { %1350 = vperm.xlu0 %1326, %v1680_v23  }
  0x34   :  { %1291 = vset.pattern.permute.xlu1 %v1616_v13 }
  0x35   :  { %1293 = vperm.xlu1 %1291, %v1666_v14   ;;  %1354 = vset.pattern.permute.xlu0 %v1614_v0 }
  0x36   :  { %1356 = vperm.xlu0 %1354, %v1676_v20  }
  0x39   :  { %1297 = vset.pattern.permute.xlu1 %v1617_v15 }
  0x3a   :  { %1299 = vperm.xlu1 %1297, %v1676_v20   ;;  %1373 = vperm.xlu0 %1354, %v1680_v23  }
  0x3e   :  { %1308 = vset.pattern.permute.xlu1 %v1614_v0  ;;  %1389 = vset.pattern.permute.xlu0 %v1615_v1 }
  0x3f   :  { %1310 = vperm.xlu1 %1308, %v1666_v14   ;;  %1391 = vperm.xlu0 %1389, %v1691_v28  }
  0x43   :  { %1314 = vset.pattern.permute.xlu1 %v1616_v13  ;;  %1407 = vset.pattern.permute.xlu0 %v1617_v15 }
  0x44   :  { %1316 = vperm.xlu1 %1314, %v1697_v32   ;;  %1409 = vperm.xlu0 %1407, %v1691_v28  }
  0x48   :  { %1337 = vset.pattern.permute.xlu1 %v1615_v1  ;;  %1426 = vperm.xlu0 %1407, %v1702_v35  }
  0x49   :  { %1339 = vperm.xlu1 %1337, %v1697_v32  }
  0x4c   :  { %1436 = vset.pattern.permute.xlu0 %v1618_v45 }
  0x4d   :  { %1343 = vset.pattern.permute.xlu1 %v1614_v0  ;;  %1438 = vperm.xlu0 %1436, %v1662_v10  }
  0x4e   :  { %1345 = vperm.xlu1 %1343, %v1697_v32  }
  0x51   :  { %1453 = vperm.xlu0 %1436, %v1697_v32  }
  0x52   :  { %1360 = vset.pattern.permute.xlu1 %v1617_v15 }
  0x53   :  { %1362 = vperm.xlu1 %1360, %v1697_v32  }
  0x55   :  { %1463 = vperm.xlu0 %1436, %v1691_v28  }
  0x57   :  { %1366 = vset.pattern.permute.xlu1 %v1615_v1 }
  0x58   :  { %1368 = vperm.xlu1 %1366, %v1680_v23  }
  0x5c   :  { %1377 = vset.pattern.permute.xlu1 %v1616_v13 }
  0x5d   :  { %1379 = vperm.xlu1 %1377, %v1691_v28  }
  0x61   :  { %1383 = vset.pattern.permute.xlu1 %v1617_v15 }
  0x62   :  { %1385 = vperm.xlu1 %1383, %v1680_v23  }
  0x66   :  { %1395 = vset.pattern.permute.xlu1 %v1614_v0 }
  0x67   :  { %1397 = vperm.xlu1 %1395, %v1691_v28  }
  0x6b   :  { %1401 = vset.pattern.permute.xlu1 %v1616_v13 }
  0x6c   :  { %1403 = vperm.xlu1 %1401, %v1702_v35  }
  0x70   :  { %1413 = vset.pattern.permute.xlu1 %v1615_v1 }
  0x71   :  { %1415 = vperm.xlu1 %1413, %v1702_v35  }
  0x75   :  { %1419 = vset.pattern.permute.xlu1 %v1614_v0 }
  0x76   :  { %1421 = vperm.xlu1 %1419, %v1702_v35  }
  0x7a   :  { %1430 = vset.pattern.permute.xlu1 %v1618_v45 }
  0x7b   :  { %1432 = vperm.xlu1 %1430, %v1658_v9  }
  0x7f   :  { %1443 = vperm.xlu1 %1430, %v1676_v20  }
  0x83   :  { %1448 = vperm.xlu1 %1430, %v1666_v14  }
  0x87   :  { %1458 = vperm.xlu1 %1430, %v1680_v23  }
  0x8b   :  { %1468 = vperm.xlu1 %1430, %v1702_v35  }
  0x96   :  { %v1253_v37 = vpop.permute.xlu1 %1252  ;;  %v1723_v38 = vpop.permute.xlu0 %1246 }
  0x97   :  { %v1254_v55 = vunpack.i.l.bf16 %v1253_v37  ;;  %v1255_v61 = vunpack.i.h.bf16 %v1253_v37 }
  0x99   :  { %v307_v3 = vmul.f32 %v1254_v55, %v1743_v54  ;;  %v308_v19 = vmul.f32 %v1255_v61, %v1743_v54 }
  0x9a   :  { %v1270_v40 = vpop.permute.xlu0 %1269 }
  0x9b   :  { %v1259_v42 = vpop.permute.xlu1 %1258 }
  0x9c   :  { %v1260_v49 = vunpack.i.l.bf16 %v1259_v42  ;;  %v1261_v51 = vunpack.i.h.bf16 %v1259_v42 }
  0x9e   :  { %v1728_v44 = vpop.permute.xlu0 %1304  ;;  %v145_v56 = vmul.f32 %v1260_v49, %v1737_v50  ;;  %v146_v58 = vmul.f32 %v1261_v51, %v1737_v50 }
  0xa0   :  { %v1265_v48 = vpop.permute.xlu1 %1264  ;;  %v1539_v7 = vadd.low.f32.bf16 %v145_v56, %v1270_v40  ;;  %v1540_v8 = vadd.high.f32.bf16 %v146_v58, %v1270_v40 }
  0xa1   :  { %v1267_v11 = vunpack.i.h.bf16 %v1265_v48  ;;  %v1266_v12 = vunpack.i.l.bf16 %v1265_v48 }
  0xa3   :  { %v1741_v53 = vpop.permute.xlu0 %1322  ;;  %v407_v30 = vmul.f32 %v1266_v12, %v1749_v62  ;;  %v408_v31 = vmul.f32 %v1267_v11, %v1749_v62 }
  0xa4   :  { %v1325_v12 = vunpack.i.h.bf16 %v1741_v53 }
  0xa5   :  { %v1276_v57 = vpop.permute.xlu1 %1275 }
  0xa6   :  { %v1278_v59 = vunpack.i.h.bf16 %v1276_v57  ;;  %v1277_v60 = vunpack.i.l.bf16 %v1276_v57 }
  0xa8   :  { %v309_v63 = vmul.f32 %v1277_v60, %v1743_v54  ;;  %v310_v0 = vmul.f32 %v1278_v59, %v1743_v54  ;;  %v1329_v1 = vpop.permute.xlu0 %1328 }
  0xa9   :  { %v1331_v5 = vunpack.i.h.bf16 %v1329_v1  ;;  %v1330_v6 = vunpack.i.l.bf16 %v1329_v1 }
  0xaa   :  { %v1282_v13 = vpop.permute.xlu1 %1281  ;;  %v325_v21 = vadd.f32 %v1539_v7, %v309_v63  ;;  %v326_v22 = vadd.f32 %v1540_v8, %v310_v0 }
  0xab   :  { %v143_v15 = vmul.f32 %v1330_v6, %v1737_v50  ;;  %v144_v16 = vmul.f32 %v1331_v5, %v1737_v50  ;;  %v1284_v17 = vunpack.i.h.bf16 %v1282_v13  ;;  %v1283_v18 = vunpack.i.l.bf16 %v1282_v13 }
  0xac   :  { %v1334_v24 = vpop.permute.xlu0 %1333  ;;  %v1324_v13 = vunpack.i.l.bf16 %v1741_v53  ;;  %v414_v53 = vmul.f32 %v1325_v12, %v1749_v62 }
  0xad   :  { %v1541_v25 = vadd.low.f32.bf16 %v143_v15, %v1723_v38  ;;  %v1542_v26 = vadd.high.f32.bf16 %v144_v16, %v1723_v38  ;;  %v409_v27 = vmul.f32 %v1283_v18, %v1749_v62  ;;  %v410_v29 = vmul.f32 %v1284_v17, %v1749_v62 }
  0xae   :  { %v1336_v42 = vunpack.i.h.bf16 %v1334_v24  ;;  %v1335_v45 = vunpack.i.l.bf16 %v1334_v24 }
  0xaf   :  { %v425_v33 = vadd.f32 %v409_v27, %v325_v21  ;;  %v426_v34 = vadd.f32 %v410_v29, %v326_v22  ;;  %v1288_v36 = vpop.permute.xlu1 %1287  ;;  %v323_v37 = vadd.f32 %v1541_v25, %v307_v3  ;;  %v324_v39 = vadd.f32 %v1542_v26, %v308_v19 }
  0xb0   :  { %v1766_v40 = vpop.permute.xlu0 %1350  ;;  %v147_v55 = vmul.f32 %v1335_v45, %v1737_v50  ;;  %v148_v56 = vmul.f32 %v1336_v42, %v1737_v50  ;;  %v413_v29 = vmul.f32 %v1324_v13, %v1749_v62 }
  0xb1   :  { %v423_v38 = vadd.f32 %v407_v30, %v323_v37  ;;  %v424_v46 = vadd.f32 %v408_v31, %v324_v39  ;;  %v441_v49 = vmax.f32 %v425_v33, 0.0  ;;  %v442_v51 = vmax.f32 %v426_v34, 0.0 }
  0xb2   :  { %v1543_v6 = vadd.low.f32.bf16 %v147_v55, %v1288_v36  ;;  %v1544_v7 = vadd.high.f32.bf16 %v148_v56, %v1288_v36  ;;  %v1353_v13 = vunpack.i.h.bf16 %v1766_v40 }
  0xb3   :  { %v439_v47 = vmax.f32 %v423_v38, 0.0  ;;  %v440_v48 = vmax.f32 %v424_v46, 0.0  ;;  %v472_v61 = vpack.c.bf16 %v442_v51, %v441_v49 }
  0xb4   :  { %v1294_v52 = vpop.permute.xlu1 %1293 }
  0xb5   :  { %v1357_v57 = vpop.permute.xlu0 %1356  ;;  %v471_v58 = vpack.c.bf16 %v440_v48, %v439_v47  ;;  %v1296_v1 = vunpack.i.h.bf16 %v1294_v52  ;;  %v1295_v3 = vunpack.i.l.bf16 %v1294_v52 }
  0xb6   :  { %v1359_v59 = vunpack.i.h.bf16 %v1357_v57  ;;  %v1358_v60 = vunpack.i.l.bf16 %v1357_v57 }
  0xb7   :  { %1148 = vmatprep.subr.bf16.mxu0 %v471_v58  ;;  %v149_v19 = vmul.f32 %v1295_v3, %v1737_v50  ;;  %v150_v21 = vmul.f32 %v1296_v1, %v1737_v50 }
  0xb8   :  { %v311_v63 = vmul.f32 %v1358_v60, %v1743_v54  ;;  %v312_v0 = vmul.f32 %v1359_v59, %v1743_v54  ;;  %1149 = vmatpush3.bf16.msra.mxu0 %v471_v58 }
  0xb9   :  { %v1300_v5 = vpop.permute.xlu1 %1299  ;;  %1150 = vmatprep.subr.bf16.mxu0 %v472_v61  ;;  %v1545_v33 = vadd.low.f32.bf16 %v149_v19, %v1728_v44  ;;  %v1546_v34 = vadd.high.f32.bf16 %v150_v21, %v1728_v44  ;;  %v1374_v19 = vpop.permute.xlu0 %1373 }
  0xba   :  { %v1302_v8 = vunpack.i.h.bf16 %v1300_v5  ;;  %v1301_v11 = vunpack.i.l.bf16 %v1300_v5  ;;  %v327_v15 = vadd.f32 %v1543_v6, %v311_v63  ;;  %v328_v16 = vadd.f32 %v1544_v7, %v312_v0 }
  0xbc   :  { %v411_v17 = vmul.f32 %v1301_v11, %v1749_v62  ;;  %v412_v18 = vmul.f32 %v1302_v8, %v1749_v62  ;;  %1151 = vmatpush3.bf16.msra.mxu0 %v472_v61 }
  0xbe   :  { %v427_v22 = vadd.f32 %v411_v17, %v327_v15  ;;  %v428_v24 = vadd.f32 %v412_v18, %v328_v16  ;;  %v1311_v25 = vpop.permute.xlu1 %1310  ;;  %v1352_v15 = vunpack.i.l.bf16 %v1766_v40 }
  0xbf   :  { %v1313_v26 = vunpack.i.h.bf16 %v1311_v25  ;;  %v1312_v27 = vunpack.i.l.bf16 %v1311_v25  ;;  %v154_v25 = vmul.f32 %v1353_v13, %v1737_v50 }
  0xc0   :  { %v443_v30 = vmax.f32 %v427_v22, 0.0  ;;  %v444_v31 = vmax.f32 %v428_v24, 0.0  ;;  %v153_v24 = vmul.f32 %v1352_v15, %v1737_v50 }
  0xc1   :  { %v313_v36 = vmul.f32 %v1312_v27, %v1743_v54  ;;  %v314_v37 = vmul.f32 %v1313_v26, %v1743_v54  ;;  %v1376_v27 = vunpack.i.h.bf16 %v1374_v19 }
  0xc2   :  { %v473_v39 = vpack.c.bf16 %v444_v31, %v443_v30  ;;  %v1392_v30 = vpop.permute.xlu0 %1391 }
  0xc3   :  { %v329_v42 = vadd.f32 %v1545_v33, %v313_v36  ;;  %v330_v45 = vadd.f32 %v1546_v34, %v314_v37  ;;  %v1317_v38 = vpop.permute.xlu1 %1316  ;;  %v318_v34 = vmul.f32 %v1376_v27, %v1743_v54 }
  0xc4   :  { %1152 = vmatprep.subr.bf16.mxu0 %v473_v39  ;;  %v1319_v55 = vunpack.i.h.bf16 %v1317_v38  ;;  %v1318_v44 = vunpack.i.l.bf16 %v1317_v38 }
  0xc5   :  { %1153 = vmatpush3.bf16.msra.mxu0 %v473_v39  ;;  %v429_v46 = vadd.f32 %v413_v29, %v329_v42  ;;  %v430_v47 = vadd.f32 %v414_v53, %v330_v45  ;;  %v1375_v29 = vunpack.i.l.bf16 %v1374_v19 }
  0xc6   :  { %v151_v59 = vmul.f32 %v1318_v44, %v1737_v50  ;;  %v152_v60 = vmul.f32 %v1319_v55, %v1737_v50  ;;  %v1410_v36 = vpop.permute.xlu0 %1409 }
  0xc7   :  { %v445_v48 = vmax.f32 %v429_v46, 0.0  ;;  %v446_v49 = vmax.f32 %v430_v47, 0.0  ;;  %v317_v40 = vmul.f32 %v1375_v29, %v1743_v54  ;;  %v1412_v46 = vunpack.i.h.bf16 %v1410_v36 }
  0xc8   :  { %v1340_v51 = vpop.permute.xlu1 %1339  ;;  %v1411_v47 = vunpack.i.l.bf16 %v1410_v36 }
  0xc9   :  { %v474_v52 = vpack.c.bf16 %v446_v49, %v445_v48  ;;  %v1547_v1 = vadd.low.f32.bf16 %v151_v59, %v1340_v51  ;;  %v1548_v3 = vadd.high.f32.bf16 %v152_v60, %v1340_v51 }
  0xcb   :  { %1154 = vmatprep.subr.bf16.mxu0 %v474_v52 }
  0xcc   :  { %1155 = vmatpush3.bf16.msra.mxu0 %v474_v52 }
  0xcd   :  { %v1346_v56 = vpop.permute.xlu1 %1345 }
  0xce   :  { %v1348_v57 = vunpack.i.h.bf16 %v1346_v56  ;;  %v1347_v58 = vunpack.i.l.bf16 %v1346_v56 }
  0xd0   :  { %v315_v61 = vmul.f32 %v1347_v58, %v1743_v54  ;;  %v316_v63 = vmul.f32 %v1348_v57, %v1743_v54 }
  0xd2   :  { %v1363_v0 = vpop.permute.xlu1 %1362  ;;  %v331_v7 = vadd.f32 %v1547_v1, %v315_v61  ;;  %v332_v8 = vadd.f32 %v1548_v3, %v316_v63  ;;  %v419_v61 = vmul.f32 %v1411_v47, %v1749_v62  ;;  %v420_v63 = vmul.f32 %v1412_v46, %v1749_v62 }
  0xd3   :  { %v1365_v5 = vunpack.i.h.bf16 %v1363_v0  ;;  %v1364_v6 = vunpack.i.l.bf16 %v1363_v0 }
  0xd5   :  { %v415_v11 = vmul.f32 %v1364_v6, %v1749_v62  ;;  %v416_v12 = vmul.f32 %v1365_v5, %v1749_v62 }
  0xd7   :  { %v431_v16 = vadd.f32 %v415_v11, %v331_v7  ;;  %v432_v17 = vadd.f32 %v416_v12, %v332_v8  ;;  %v1369_v18 = vpop.permute.xlu1 %1368 }
  0xd8   :  { %v1549_v31 = vadd.low.f32.bf16 %v153_v24, %v1369_v18  ;;  %v1550_v33 = vadd.high.f32.bf16 %v154_v25, %v1369_v18  ;;  %v1427_v25 = vpop.permute.xlu0 %1426 }
  0xd9   :  { %v447_v21 = vmax.f32 %v431_v16, 0.0  ;;  %v448_v22 = vmax.f32 %v432_v17, 0.0  ;;  %v1428_v27 = vunpack.i.l.bf16 %v1427_v25 }
  0xda   :  { %v333_v48 = vadd.f32 %v1549_v31, %v317_v40  ;;  %v334_v49 = vadd.f32 %v1550_v33, %v318_v34 }
  0xdb   :  { %v475_v26 = vpack.c.bf16 %v448_v22, %v447_v21 }
  0xdc   :  { %v1380_v53 = vpop.permute.xlu1 %1379 }
  0xdd   :  { %1156 = vmatprep.subr.bf16.mxu0 %v475_v26  ;;  %v1382_v37 = vunpack.i.h.bf16 %v1380_v53  ;;  %v1381_v39 = vunpack.i.l.bf16 %v1380_v53 }
  0xde   :  { %1157 = vmatpush3.bf16.msra.mxu0 %v475_v26  ;;  %v1429_v26 = vunpack.i.h.bf16 %v1427_v25 }
  0xdf   :  { %v155_v55 = vmul.f32 %v1381_v39, %v1737_v50  ;;  %v156_v44 = vmul.f32 %v1382_v37, %v1737_v50  ;;  %v421_v39 = vmul.f32 %v1428_v27, %v1749_v62 }
  0xe1   :  { %v1386_v42 = vpop.permute.xlu1 %1385  ;;  %v1551_v3 = vadd.low.f32.bf16 %v155_v55, %v1392_v30  ;;  %v1552_v5 = vadd.high.f32.bf16 %v156_v44, %v1392_v30  ;;  %v1519_v55 = vld [vmem:[#allocation2 + $0x58] sm:$0xff]   ;;  %v1520_v44 = vld [vmem:[#allocation2 + $0x60] sm:$0xff]  }
  0xe2   :  { %v1388_v45 = vunpack.i.h.bf16 %v1386_v42  ;;  %v1387_v38 = vunpack.i.l.bf16 %v1386_v42  ;;  %v422_v42 = vmul.f32 %v1429_v26, %v1749_v62 }
  0xe4   :  { %v417_v51 = vmul.f32 %v1387_v38, %v1749_v62  ;;  %v418_v52 = vmul.f32 %v1388_v45, %v1749_v62  ;;  %v1523_v62 = vld [vmem:[#allocation2 + $0x78] sm:$0xff]  }
  0xe6   :  { %v433_v56 = vadd.f32 %v417_v51, %v333_v48  ;;  %v434_v57 = vadd.f32 %v418_v52, %v334_v49  ;;  %v1398_v58 = vpop.permute.xlu1 %1397  ;;  %v1518_v52 = vld [vmem:[#allocation2 + $0x50] sm:$0xff]  }
  0xe7   :  { %v1400_v59 = vunpack.i.h.bf16 %v1398_v58  ;;  %v1399_v60 = vunpack.i.l.bf16 %v1398_v58  ;;  %v1619_v58 = vmov 5  }
  0xe8   :  { %v449_v0 = vmax.f32 %v433_v56, 0.0  ;;  %v450_v1 = vmax.f32 %v434_v57, 0.0  ;;  %v1522_v56 = vld [vmem:[#allocation2 + $0x70] sm:$0xff]   ;;  %v1524_v57 = vld [vmem:[#allocation2 + $0x80] sm:$0xff]   ;;  %1472 = vset.pattern.permute.xlu0 %v1619_v58  ;;  %1478 = vset.pattern.permute.xlu1 %v1619_v58 }
  0xe9   :  { %v319_v6 = vmul.f32 %v1399_v60, %v1743_v54  ;;  %v320_v7 = vmul.f32 %v1400_v59, %v1743_v54  ;;  %1196 = vmatprep.mubr.bf16.mxu1 %v1524_v57  ;;  %1474 = vperm.xlu0 %1472, %v1658_v9   ;;  %v1439_v60 = vpop.permute.xlu0 %1438 }
  0xea   :  { %v476_v8 = vpack.c.bf16 %v450_v1, %v449_v0  ;;  %1480 = vperm.xlu1 %1478, %v1662_v10  }
  0xeb   :  { %v335_v11 = vadd.f32 %v1551_v3, %v319_v6  ;;  %v336_v12 = vadd.f32 %v1552_v5, %v320_v7  ;;  %v1404_v13 = vpop.permute.xlu1 %1403 }
  0xec   :  { %1158 = vmatprep.subr.bf16.mxu0 %v476_v8  ;;  %v1406_v22 = vunpack.i.h.bf16 %v1404_v13  ;;  %v1405_v24 = vunpack.i.l.bf16 %v1404_v13 }
  0xed   :  { %v435_v15 = vadd.f32 %v419_v61, %v335_v11  ;;  %v436_v16 = vadd.f32 %v420_v63, %v336_v12  ;;  %1159 = vmatpush3.bf16.msra.mxu0 %v476_v8  ;;  %1490 = vperm.xlu0 %1472, %v1666_v14   ;;  %v1454_v26 = vpop.permute.xlu0 %1453 }
  0xee   :  { %v157_v53 = vmul.f32 %v1405_v24, %v1737_v50  ;;  %v158_v30 = vmul.f32 %v1406_v22, %v1737_v50  ;;  %v1517_v50 = vld [vmem:[#allocation2 + $0x48] sm:$0xff]   ;;  %1485 = vperm.xlu1 %1478, %v1676_v20  }
  0xef   :  { %v451_v17 = vmax.f32 %v435_v15, 0.0  ;;  %v452_v18 = vmax.f32 %v436_v16, 0.0 }
  0xf0   :  { %v1416_v19 = vpop.permute.xlu1 %1415 }
  0xf1   :  { %v477_v21 = vpack.c.bf16 %v452_v18, %v451_v17  ;;  %v1553_v40 = vadd.low.f32.bf16 %v157_v53, %v1416_v19  ;;  %v1554_v34 = vadd.high.f32.bf16 %v158_v30, %v1416_v19  ;;  %1500 = vperm.xlu0 %1472, %v1680_v23  }
  0xf2   :  { %1495 = vperm.xlu1 %1478, %v1697_v32  }
  0xf3   :  { %1160 = vmatprep.subr.bf16.mxu0 %v477_v21 }
  0xf4   :  { %1161 = vmatpush3.bf16.msra.mxu0 %v477_v21 }
  0xf5   :  { %v1422_v29 = vpop.permute.xlu1 %1421  ;;  %1510 = vperm.xlu0 %1472, %v1702_v35  }
  0xf6   :  { %v1424_v31 = vunpack.i.h.bf16 %v1422_v29  ;;  %v1423_v33 = vunpack.i.l.bf16 %v1422_v29  ;;  %1505 = vperm.xlu1 %1478, %v1691_v28  }
  0xf8   :  { %v321_v36 = vmul.f32 %v1423_v33, %v1743_v54  ;;  %v322_v37 = vmul.f32 %v1424_v31, %v1743_v54  ;;  %v1521_v54 = vld [vmem:[#allocation2 + $0x68] sm:$0xff]  }
  0xfa   :  { %v337_v45 = vadd.f32 %v1553_v40, %v321_v36  ;;  %v338_v38 = vadd.f32 %v1554_v34, %v322_v37  ;;  %v1433_v59 = vpop.permute.xlu1 %1432 }
  0xfc   :  { %v437_v46 = vadd.f32 %v421_v39, %v337_v45  ;;  %v438_v47 = vadd.f32 %v422_v42, %v338_v38  ;;  %v1464_v42 = vpop.permute.xlu0 %1463 }
  0xfe   :  { %v453_v48 = vmax.f32 %v437_v46, 0.0  ;;  %v454_v49 = vmax.f32 %v438_v47, 0.0  ;;  %v1444_v61 = vpop.permute.xlu1 %1443 }
 0x100   :  { %v478_v51 = vpack.c.bf16 %v454_v49, %v453_v48 }
 0x102   :  { %1162 = vmatprep.subr.bf16.mxu0 %v478_v51  ;;  %v1449_v23 = vpop.permute.xlu1 %1448 }
 0x103   :  { %1163 = vmatpush3.bf16.msra.mxu0 %v478_v51 }
 0x106   :  { %1165 = vmatmul.mubr.bf16.vlgmr.msra.gmra.mrb[0].mxu0 %v1517_v50  ;;  %v1459_v22 = vpop.permute.xlu1 %1458 }
 0x107   :  { %1168 = vmatprep.mubr.bf16.mxu0 %v1518_v52 }
 0x10a   :  { %v1469_v37 = vpop.permute.xlu1 %1468 }
 0x10e   :  { %1169 = vmatmul.mubr.bf16.gmra.mrb[4].mxu0 %v1519_v55 }
 0x10f   :  { %1172 = vmatprep.mubr.bf16.mxu0 %v1520_v44 }
 0x116   :  { %1173 = vmatmul.mubr.bf16.gmra.mrb[8].mxu0 %v1521_v54 }
 0x117   :  { %1176 = vmatprep.mubr.bf16.mxu0 %v1522_v56 }
 0x11e   :  { %1177 = vmatmul.mubr.bf16.gmra.mrb[12].mxu0 %v1523_v62 }
 0x1d9   :  { %v1166_v63 = vpop.f32.mrb[0].mxu0 }
 0x1da   :  { %v1555_v0 = vadd.low.f32.bf16 %v1166_v63, %v1439_v60  ;;  %v625_v9 = vpop.f32.mrb[1].mxu0 }
 0x1db   :  { %v1556_v1 = vadd.low.f32.bf16 %v625_v9, %v1433_v59  ;;  %v1167_v10 = vpop.f32.mrb[2].mxu0  ;;  %v1526_v9 = vld [vmem:[#allocation2 + $0x90] sm:$0xff]  }
 0x1dc   :  { %v1557_v3 = vadd.high.f32.bf16 %v1167_v10, %v1439_v60  ;;  %v628_v14 = vpop.f32.mrb[3].mxu0  ;;  %v690_v20 = vmax.f32 %v1555_v0, 0.0  ;;  %v1525_v0 = vld [vmem:[#allocation2 + $0x88] sm:$0xff]   ;;  %v1528_v10 = vld [vmem:[#allocation2 + $0xa0] sm:$0xff]  }
 0x1dd   :  { %v1558_v5 = vadd.high.f32.bf16 %v628_v14, %v1433_v59  ;;  %v688_v7 = vmax.f32 %v1556_v1, 0.0  ;;  %v1527_v1 = vld [vmem:[#allocation2 + $0x98] sm:$0xff]   ;;  %v1530_v14 = vld [vmem:[#allocation2 + $0xb0] sm:$0xff]  }
 0x1de   :  { %v691_v6 = vmax.f32 %v1557_v3, 0.0  ;;  %v1529_v3 = vld [vmem:[#allocation2 + $0xa8] sm:$0xff]  }
 0x1df   :  { %v689_v32 = vmax.f32 %v1558_v5, 0.0  ;;  %v1531_v5 = vld [vmem:[#allocation2 + $0xb8] sm:$0xff]  }
 0x1e0   :  { %v721_v8 = vpack.c.bf16 %v691_v6, %v690_v20  ;;  %v1620_v20 = vmov 0.0   ;;  %v1622_v6 = vmov 6  }
 0x1e1   :  { %v1170_v35 = vpop.f32.mrb[4].mxu0  ;;  %v720_v11 = vpack.c.bf16 %v689_v32, %v688_v7  ;;  %1212 = vmatprep.subr.bf16.mxu0 %v1620_v20  ;;  %1228 = vmatprep.mubr.msk.bf16.mxu0 %vm1621_vm0, %v1620_v20  ;;  %v1475_v7 = vpop.permute.xlu0 %1474 }
 0x1e2   :  { %v1559_v28 = vadd.low.f32.bf16 %v1170_v35, %v1449_v23  ;;  %v641_v12 = vpop.f32.mrb[5].mxu0  ;;  %1514 = vset.pattern.permute.xlu1 %v1622_v6  ;;  %1515 = vset.pattern.permute.xlu0 %v1622_v6 }
 0x1e3   :  { %v1560_v13 = vadd.low.f32.bf16 %v641_v12, %v1444_v61  ;;  %v1171_v15 = vpop.f32.mrb[6].mxu0  ;;  %1180 = vmatprep.subr.bf16.mxu1 %v720_v11  ;;  %964 = vperm.xlu1 %1514, %v1070_v4  }
 0x1e4   :  { %v1561_v16 = vadd.high.f32.bf16 %v1171_v15, %v1449_v23  ;;  %v644_v17 = vpop.f32.mrb[7].mxu0  ;;  %1181 = vmatpush3.bf16.msra.mxu1 %v720_v11  ;;  %v694_v19 = vmax.f32 %v1559_v28, 0.0  ;;  %v1481_v23 = vpop.permute.xlu1 %1480 }
 0x1e5   :  { %v1562_v18 = vadd.high.f32.bf16 %v644_v17, %v1444_v61  ;;  %1182 = vmatprep.subr.bf16.mxu1 %v721_v8  ;;  %v692_v24 = vmax.f32 %v1560_v13, 0.0 }
 0x1e6   :  { %v695_v21 = vmax.f32 %v1561_v16, 0.0 }
 0x1e7   :  { %v693_v25 = vmax.f32 %v1562_v18, 0.0  ;;  %v1491_v18 = vpop.permute.xlu0 %1490 }
 0x1e8   :  { %v723_v27 = vpack.c.bf16 %v695_v21, %v694_v19  ;;  %1183 = vmatpush3.bf16.msra.mxu1 %v721_v8 }
 0x1e9   :  { %v722_v29 = vpack.c.bf16 %v693_v25, %v692_v24  ;;  %v1174_v53 = vpop.f32.mrb[8].mxu0 }
 0x1ea   :  { %v1563_v30 = vadd.low.f32.bf16 %v1174_v53, %v1459_v22  ;;  %v657_v31 = vpop.f32.mrb[9].mxu0 }
 0x1eb   :  { %v1564_v33 = vadd.low.f32.bf16 %v657_v31, %v1454_v26  ;;  %v1175_v40 = vpop.f32.mrb[10].mxu0  ;;  %1184 = vmatprep.subr.bf16.mxu1 %v722_v29 }
 0x1ec   :  { %v1565_v34 = vadd.high.f32.bf16 %v1175_v40, %v1459_v22  ;;  %v660_v36 = vpop.f32.mrb[11].mxu0  ;;  %1185 = vmatpush3.bf16.msra.mxu1 %v722_v29  ;;  %v698_v45 = vmax.f32 %v1563_v30, 0.0  ;;  %v1486_v22 = vpop.permute.xlu1 %1485 }
 0x1ed   :  { %v1566_v39 = vadd.high.f32.bf16 %v660_v36, %v1454_v26  ;;  %1186 = vmatprep.subr.bf16.mxu1 %v723_v27  ;;  %v696_v46 = vmax.f32 %v1564_v33, 0.0 }
 0x1ee   :  { %v699_v38 = vmax.f32 %v1565_v34, 0.0  ;;  %v1501_v34 = vpop.permute.xlu0 %1500 }
 0x1ef   :  { %v697_v47 = vmax.f32 %v1566_v39, 0.0 }
 0x1f0   :  { %v725_v48 = vpack.c.bf16 %v699_v38, %v698_v45  ;;  %1187 = vmatpush3.bf16.msra.mxu1 %v723_v27  ;;  %v1496_v39 = vpop.permute.xlu1 %1495 }
 0x1f1   :  { %v724_v49 = vpack.c.bf16 %v697_v47, %v696_v46  ;;  %v1178_v51 = vpop.f32.mrb[12].mxu0 }
 0x1f2   :  { %v1567_v50 = vadd.low.f32.bf16 %v1178_v51, %v1469_v37  ;;  %v673_v52 = vpop.f32.mrb[13].mxu0 }
 0x1f3   :  { %v1568_v55 = vadd.low.f32.bf16 %v673_v52, %v1464_v42  ;;  %v1179_v44 = vpop.f32.mrb[14].mxu0  ;;  %1188 = vmatprep.subr.bf16.mxu1 %v724_v49  ;;  %v1511_v52 = vpop.permute.xlu0 %1510 }
 0x1f4   :  { %v1569_v54 = vadd.high.f32.bf16 %v1179_v44, %v1469_v37  ;;  %v676_v56 = vpop.f32.mrb[15].mxu0  ;;  %1189 = vmatpush3.bf16.msra.mxu1 %v724_v49  ;;  %v702_v57 = vmax.f32 %v1567_v50, 0.0  ;;  %v1506_v44 = vpop.permute.xlu1 %1505 }
 0x1f5   :  { %v1570_v62 = vadd.high.f32.bf16 %v676_v56, %v1464_v42  ;;  %1190 = vmatprep.subr.bf16.mxu1 %v725_v48  ;;  %v700_v59 = vmax.f32 %v1568_v55, 0.0 }
 0x1f6   :  { %v703_v58 = vmax.f32 %v1569_v54, 0.0 }
 0x1f7   :  { %v701_v60 = vmax.f32 %v1570_v62, 0.0 }
 0x1f8   :  { %v727_v61 = vpack.c.bf16 %v703_v58, %v702_v57  ;;  %1191 = vmatpush3.bf16.msra.mxu1 %v725_v48 }
 0x1f9   :  { %v726_v63 = vpack.c.bf16 %v701_v60, %v700_v59 }
 0x1fb   :  { %1192 = vmatprep.subr.bf16.mxu1 %v726_v63 }
 0x1fc   :  { %1193 = vmatpush3.bf16.msra.mxu1 %v726_v63 }
 0x1fd   :  { %1194 = vmatprep.subr.bf16.mxu1 %v727_v61 }
 0x200   :  { %1195 = vmatpush3.bf16.msra.mxu1 %v727_v61 }
 0x203   :  { %1197 = vmatmul.mubr.bf16.vlgmr.msra.gmra.mrb[0].mxu1 %v1525_v0 }
 0x204   :  { %1200 = vmatprep.mubr.bf16.mxu1 %v1526_v9 }
 0x20b   :  { %1201 = vmatmul.mubr.bf16.gmra.mrb[4].mxu1 %v1527_v1 }
 0x20c   :  { %1204 = vmatprep.mubr.bf16.mxu1 %v1528_v10 }
 0x213   :  { %1205 = vmatmul.mubr.bf16.gmra.mrb[8].mxu1 %v1529_v3 }
 0x214   :  { %1208 = vmatprep.mubr.bf16.mxu1 %v1530_v14 }
 0x21b   :  { %1209 = vmatmul.mubr.bf16.gmra.mrb[12].mxu1 %v1531_v5 }
 0x2d6   :  { %v1198_v32 = vpop.f32.mrb[0].mxu1 }
 0x2d7   :  { %v1571_v8 = vadd.low.f32.bf16 %v1198_v32, %v1481_v23  ;;  %v874_v35 = vpop.f32.mrb[1].mxu1 }
 0x2d8   :  { %v1572_v11 = vadd.low.f32.bf16 %v874_v35, %v1475_v7  ;;  %v1199_v28 = vpop.f32.mrb[2].mxu1  ;;  %v965_v35 = vpop.permute.xlu1 %964 }
 0x2d9   :  { %v1573_v12 = vadd.high.f32.bf16 %v1199_v28, %v1481_v23  ;;  %v877_v13 = vpop.f32.mrb[3].mxu1  ;;  %v939_v16 = vmax.f32 %v1571_v8, 0.0  ;;  %v1532_v8 = vld [vmem:[#allocation2 + $0xc0] sm:$0xff]  }
 0x2da   :  { %v1574_v15 = vadd.high.f32.bf16 %v877_v13, %v1475_v7  ;;  %v937_v19 = vmax.f32 %v1572_v11, 0.0 }
 0x2db   :  { %v940_v17 = vmax.f32 %v1573_v12, 0.0 }
 0x2dc   :  { %v938_v21 = vmax.f32 %v1574_v15, 0.0 }
 0x2dd   :  { %v956_v24 = vpack.c.bf16 %v940_v17, %v939_v16 }
 0x2de   :  { %v955_v25 = vpack.c.bf16 %v938_v21, %v937_v19  ;;  %v1202_v2 = vpop.f32.mrb[4].mxu1 }
 0x2df   :  { %v1575_v4 = vadd.low.f32.bf16 %v1202_v2, %v1491_v18  ;;  %v890_v26 = vpop.f32.mrb[5].mxu1 }
 0x2e0   :  { %v1576_v27 = vadd.low.f32.bf16 %v890_v26, %v1486_v22  ;;  %v1203_v29 = vpop.f32.mrb[6].mxu1  ;;  %1213 = vmatpush3.bf16.msra.mxu0 %v955_v25 }
 0x2e1   :  { %v1577_v53 = vadd.high.f32.bf16 %v1203_v29, %v1491_v18  ;;  %v893_v30 = vpop.f32.mrb[7].mxu1  ;;  %1214 = vmatprep.subr.bf16.mxu0 %v1620_v20  ;;  %v943_v33 = vmax.f32 %v1575_v4, 0.0 }
 0x2e2   :  { %v1578_v31 = vadd.high.f32.bf16 %v893_v30, %v1486_v22  ;;  %v941_v36 = vmax.f32 %v1576_v27, 0.0 }
 0x2e3   :  { %v944_v40 = vmax.f32 %v1577_v53, 0.0 }
 0x2e4   :  { %v942_v37 = vmax.f32 %v1578_v31, 0.0  ;;  %1215 = vmatpush3.bf16.msra.mxu0 %v956_v24 }
 0x2e5   :  { %v958_v42 = vpack.c.bf16 %v944_v40, %v943_v33  ;;  %1216 = vmatprep.subr.bf16.mxu0 %v1620_v20 }
 0x2e6   :  { %v957_v45 = vpack.c.bf16 %v942_v37, %v941_v36  ;;  %v1206_v38 = vpop.f32.mrb[8].mxu1 }
 0x2e7   :  { %v1579_v46 = vadd.low.f32.bf16 %v1206_v38, %v1501_v34  ;;  %v906_v47 = vpop.f32.mrb[9].mxu1 }
 0x2e8   :  { %v1580_v48 = vadd.low.f32.bf16 %v906_v47, %v1496_v39  ;;  %v1207_v49 = vpop.f32.mrb[10].mxu1  ;;  %1217 = vmatpush3.bf16.msra.mxu0 %v957_v45 }
 0x2e9   :  { %v1581_v51 = vadd.high.f32.bf16 %v1207_v49, %v1501_v34  ;;  %v909_v50 = vpop.f32.mrb[11].mxu1  ;;  %1218 = vmatprep.subr.bf16.mxu0 %v1620_v20  ;;  %v947_v54 = vmax.f32 %v1579_v46, 0.0 }
 0x2ea   :  { %v1582_v55 = vadd.high.f32.bf16 %v909_v50, %v1496_v39  ;;  %v945_v62 = vmax.f32 %v1580_v48, 0.0 }
 0x2eb   :  { %v948_v56 = vmax.f32 %v1581_v51, 0.0 }
 0x2ec   :  { %v946_v57 = vmax.f32 %v1582_v55, 0.0  ;;  %1219 = vmatpush3.bf16.msra.mxu0 %v958_v42 }
 0x2ed   :  { %v960_v58 = vpack.c.bf16 %v948_v56, %v947_v54  ;;  %1220 = vmatprep.subr.bf16.mxu0 %v1620_v20 }
 0x2ee   :  { %v959_v59 = vpack.c.bf16 %v946_v57, %v945_v62  ;;  %v1210_v60 = vpop.f32.mrb[12].mxu1 }
 0x2ef   :  { %v1583_v61 = vadd.low.f32.bf16 %v1210_v60, %v1511_v52  ;;  %v922_v63 = vpop.f32.mrb[13].mxu1 }
 0x2f0   :  { %v1584_v0 = vadd.low.f32.bf16 %v922_v63, %v1506_v44  ;;  %v1211_v9 = vpop.f32.mrb[14].mxu1  ;;  %1221 = vmatpush3.bf16.msra.mxu0 %v959_v59 }
 0x2f1   :  { %v1585_v1 = vadd.high.f32.bf16 %v1211_v9, %v1511_v52  ;;  %v925_v10 = vpop.f32.mrb[15].mxu1  ;;  %1222 = vmatprep.subr.bf16.mxu0 %v1620_v20  ;;  %v951_v14 = vmax.f32 %v1583_v61, 0.0 }
 0x2f2   :  { %v1586_v3 = vadd.high.f32.bf16 %v925_v10, %v1506_v44  ;;  %v949_v6 = vmax.f32 %v1584_v0, 0.0 }
 0x2f3   :  { %v952_v5 = vmax.f32 %v1585_v1, 0.0 }
 0x2f4   :  { %v950_v23 = vmax.f32 %v1586_v3, 0.0  ;;  %1223 = vmatpush3.bf16.msra.mxu0 %v960_v58 }
 0x2f5   :  { %v962_v7 = vpack.c.bf16 %v952_v5, %v951_v14  ;;  %1224 = vmatprep.subr.bf16.mxu0 %v1620_v20 }
 0x2f6   :  { %v961_v32 = vpack.c.bf16 %v950_v23, %v949_v6 }
 0x2f8   :  { %1225 = vmatpush3.bf16.msra.mxu0 %v961_v32 }
 0x2f9   :  { %1226 = vmatprep.subr.bf16.mxu0 %v1620_v20 }
 0x2fc   :  { %1227 = vmatpush3.bf16.msra.mxu0 %v962_v7 }
 0x2ff   :  { %1229 = vmatmul.mubr.bf16.vlgmr.msra.gmra.mrb[16].mxu0 %v1532_v8 }
 0x3d2   :  { %v1010_v11 = vpop.f32.mrb[16].mxu0 }
 0x3d3   :  { %v1011_v28 = vadd.f32 %v1010_v11, %v965_v35  ;;  %v1230_v12 = vpop.f32.mrb[17].mxu0 }
 0x3d4   :  { %v1013_v13 = vpop.f32.mrb[18].mxu0 }
 0x3d5   :  { %v1017_v15 = vrot.slane %v1011_v28, 1  ;;  %v1231_v16 = vpop.f32.mrb[19].mxu0 }
 0x3d7   :  { %v1019_v17 = vmax.f32 %v1011_v28, %v1017_v15 }
 0x3d9   :  { %v1020_v18 = vsub.f32 %v1011_v28, %v1019_v17  ;;  %v1024_v19 = vrot.slane %v1019_v17, 7 }
 0x3db   :  { %v1026_v21 = vsub.f32 %v1011_v28, %v1024_v19  ;;  %v1021_v22 = vmul.f32 1.442695, %v1020_v18 }
 0x3dd   :  { %v1027_v24 = vmul.f32 1.442695, %v1026_v21 }
 0x3df   :  { %1533 = vpow2.f32 %v1027_v24 }
 0x3e0   :  { %1535 = vpow2.f32 %v1021_v22 }
 0x3e9   :  { %v1534_v25 = vpop.eup %1533 }
 0x3ea   :  { %v1030_v20 = vrot.slane %v1534_v25, 1  ;;  %v1536_v2 = vpop.eup %1535 }
 0x3ec   :  { %v1032_v4 = vadd.f32 %v1536_v2, %v1030_v20 }
 0x3ee   :  { %1537 = vlog2.f32 %v1032_v4 }
 0x3f8   :  { %v1538_v26 = vpop.eup %1537 }
 0x3f9   :  { %v1034_v27 = vmul.f32 0.6931472, %v1538_v26 }
 0x3fb   :  { %v1035_v29 = vadd.f32 %v1034_v27, %v1019_v17 }
 0x3fd   :  { %v1042_v53 = vrot.slane %v1035_v29, %v141_v43 }
 0x3ff   :  { %v1043_v30 = vsel %vm1038_vm1, %v1042_v53, 0.0 }
 0x400   :  { %v1044_v31 = vsub.f32 %v1011_v28, %v1043_v30 }
 0x402   :  { %1045 = vst [vmem:[%s1838_s2] sm:$0xff] %v1044_v31 }
 0x403   :  { %1050 = vsyncpa [#allocation3], 1 }

</bundles_post_ra>
